<compile_context>
chip_gen: v5e
topology: v5e:2x2
jax: 0.10.0
libtpu: 0.0.40
codegen_flags: <defaults>
</compile_context>

<pallas_src>
from functools import partial

import numpy as np
import jax
import jax.numpy as jnp
from jax.experimental import pallas as pl
from jax.experimental.pallas import tpu as pltpu

EPS = 1e-5
LANES = 128   # lane width of the packed parameter slab
B2_LANE = 64  # lane offset of b2 inside the beta row of the slab


def _make_kernel(in_features, n_hidden, out_features, batch):
    # Static row offsets into the packed [P, 128] parameter slab.
    row_gamma = 0
    row_beta = 1                      # beta in lanes [0:IN], b2 in lanes [64:64+OUT]
    row_w1 = 2                        # in_features rows: w1[k, :n_hidden]
    row_b1 = row_w1 + in_features     # 1 row:            b1[:n_hidden]
    row_w2t = row_b1 + 1              # out_features rows: w2[:, o] in lanes [0:n_hidden]
    inv_b = 1.0 / batch

    def kernel(x_ref, p_ref, out_ref):
        x = x_ref[...]   # [B, IN] f32
        p = p_ref[...]   # [P, 128] f32 packed params (zero-padded lanes/rows)

        # --- BatchNorm1d(x), training mode, fused single-pass batch stats ---
        s = jnp.sum(x, axis=0, keepdims=True)
        ss = jnp.sum(x * x, axis=0, keepdims=True)
        mean = s * inv_b
        var = jnp.maximum(ss * inv_b - mean * mean, 0.0)   # biased, clamped >= 0
        gamma = p[row_gamma:row_gamma + 1, :in_features]
        beta = p[row_beta:row_beta + 1, :in_features]
        xn = (x - mean) * (jax.lax.rsqrt(var + EPS) * gamma) + beta   # [B, IN]

        # --- linear1 + ReLU: unrolled VPU broadcast-FMAs (K = in_features) ---
        # Weight/bias rows are zero beyond lane n_hidden, so acc1/h1 lanes
        # >= n_hidden stay exactly 0 (relied upon by the linear2 reduction;
        # ReLU(0) = 0 preserves it).
        acc1 = xn[:, 0:1] * p[row_w1:row_w1 + 1, :] + p[row_b1:row_b1 + 1, :]
        for k in range(1, in_features):
            acc1 = acc1 + xn[:, k:k + 1] * p[row_w1 + k:row_w1 + k + 1, :]
        h1 = jnp.maximum(acc1, 0.0)                       # [B, 128]

        # --- linear2: per-output-column XLU lane reduction over h1 * w2^T ---
        cols = []
        for o in range(out_features):
            w2row = p[row_w2t + o:row_w2t + o + 1, :]              # [1, 128]
            b2_o = p[row_beta:row_beta + 1,
                     B2_LANE + o:B2_LANE + o + 1]                  # [1, 1]
            cols.append(jnp.sum(h1 * w2row, axis=1, keepdims=True) + b2_o)
        out = cols[0] if out_features == 1 else jnp.concatenate(cols, axis=1)

        out_ref[...] = out.astype(out_ref.dtype)          # [B, OUT] store

    return kernel


@partial(jax.jit, static_argnames=("in_features", "n_hidden", "out_features"))
def relu_class1_norm1_forward(x, param_slab, *, in_features, n_hidden,
                              out_features):
    """x: [B, in_features] f32.  param_slab: packed [P, 128] f32 (pack_params)."""
    B = x.shape[0]
    kernel = _make_kernel(in_features, n_hidden, out_features, B)
    vmem = pl.BlockSpec(memory_space=pltpu.MemorySpace.VMEM)
    cost = pl.CostEstimate(
        flops=2 * B * (in_features * n_hidden + n_hidden * out_features)
        + 8 * B * in_features,                       # BN + activations (approx)
        transcendentals=in_features,                 # rsqrt per feature
        bytes_accessed=4 * (x.size + param_slab.size + B * out_features),
    )
    return pl.pallas_call(
        kernel,
        out_shape=jax.ShapeDtypeStruct((B, out_features), jnp.float32),
        in_specs=[vmem, vmem],
        out_specs=vmem,
        cost_estimate=cost,
    )(x, param_slab)


def init_params(key, in_features=4, n_hidden=4, out_features=1):
    """PyTorch-style uniform(-1/sqrt(fan_in), 1/sqrt(fan_in)) Linear init.
    Linear weights stored [in, out] (transposed vs. torch); BN gamma=1, beta=0."""
    k1, k2, k3, k4 = jax.random.split(key, 4)
    bw1 = 1.0 / (in_features ** 0.5)
    bw2 = 1.0 / (n_hidden ** 0.5)
    return {
        "w1": jax.random.uniform(k1, (in_features, n_hidden), jnp.float32, -bw1, bw1),
        "b1": jax.random.uniform(k2, (n_hidden,), jnp.float32, -bw1, bw1),
        "w2": jax.random.uniform(k3, (n_hidden, out_features), jnp.float32, -bw2, bw2),
        "b2": jax.random.uniform(k4, (out_features,), jnp.float32, -bw2, bw2),
        "gamma": jnp.ones((in_features,), jnp.float32),
        "beta": jnp.zeros((in_features,), jnp.float32),
    }


def pack_params(params, in_features, n_hidden, out_features):
    """Pack all parameters into one zero-padded [P, 128] f32 slab (single DMA).

    Layout (rows):
      0              : gamma[:IN]
      1              : beta[:IN], b2[:OUT] at lanes [64:64+OUT]
      2 .. 1+IN      : w1[k, :H]
      2+IN           : b1[:H]
      3+IN .. 2+IN+OUT: w2[:, o] (transposed) in lanes [0:H]
    """
    assert in_features <= B2_LANE and B2_LANE + out_features <= LANES
    assert n_hidden <= LANES
    rows = 3 + in_features + out_features
    prows = max(8, ((rows + 7) // 8) * 8)   # sublane-aligned row count (8 here)
    slab = np.zeros((prows, LANES), np.float32)
    slab[0, :in_features] = np.asarray(params["gamma"])
    slab[1, :in_features] = np.asarray(params["beta"])
    slab[1, B2_LANE:B2_LANE + out_features] = np.asarray(params["b2"])
    slab[2:2 + in_features, :n_hidden] = np.asarray(params["w1"])
    slab[2 + in_features, :n_hidden] = np.asarray(params["b1"])
    slab[3 + in_features:3 + in_features + out_features, :n_hidden] = (
        np.asarray(params["w2"]).T)
    return jnp.asarray(slab)


if __name__ == "__main__":
    key = jax.random.PRNGKey(0)
    k_x, k_p = jax.random.split(key)

    # in_features == n_hidden (=4) so BatchNorm1d(n_hidden)(x) is well-formed.
    B, IN, H, OUT = 8, 4, 4, 1
    x = jax.random.normal(k_x, (B, IN), jnp.float32)
    params = init_params(k_p, in_features=IN, n_hidden=H, out_features=OUT)
    slab = pack_params(params, IN, H, OUT)   # packed once, outside the kernel

    out = relu_class1_norm1_forward(x, slab, in_features=IN, n_hidden=H,
                                    out_features=OUT)
    jax.block_until_ready(out)
    assert out.shape == (B, OUT), out.shape

    # Pure-JAX reference (training-mode BatchNorm1d -> linear1 -> relu -> linear2)
    mean = jnp.mean(x, axis=0, keepdims=True)
    var = jnp.mean((x - mean) ** 2, axis=0, keepdims=True)
    xn = (x - mean) / jnp.sqrt(var + EPS) * params["gamma"] + params["beta"]
    h = jnp.maximum(xn @ params["w1"] + params["b1"], 0.0)
    ref = h @ params["w2"] + params["b2"]
    assert jnp.allclose(out, ref, atol=1e-4, rtol=1e-4), "mismatch vs reference"

    print("KERNEL_OK")
</pallas_src>

<mosaic_0001>
module attributes {stable_mosaic.version = 11 : i64} {
  func.func @kernel(%arg0: memref<8x4xf32, #tpu.memory_space<vmem>>, %arg1: memref<8x128xf32, #tpu.memory_space<vmem>>, %arg2: memref<8x1xf32, #tpu.memory_space<vmem>>) attributes {dimension_semantics = [], scalar_prefetch = 0 : i64, scratch_operands = 0 : i64, tpu.core_type = #tpu.core_type<tc>} {
    %c0 = arith.constant 0 : index
    %c0_0 = arith.constant 0 : index
    %0 = vector.load %arg0[%c0, %c0_0] : memref<8x4xf32, #tpu.memory_space<vmem>>, vector<8x4xf32>
    %c0_1 = arith.constant 0 : index
    %c0_2 = arith.constant 0 : index
    %1 = vector.load %arg1[%c0_1, %c0_2] : memref<8x128xf32, #tpu.memory_space<vmem>>, vector<8x128xf32>
    %cst = arith.constant dense<0.000000e+00> : vector<4xf32>
    %2 = vector.multi_reduction <add>, %0, %cst [0] : vector<8x4xf32> to vector<4xf32>
    %3 = vector.shape_cast %2 : vector<4xf32> to vector<1x4xf32>
    %4 = arith.mulf %0, %0 : vector<8x4xf32>
    %cst_3 = arith.constant dense<0.000000e+00> : vector<4xf32>
    %5 = vector.multi_reduction <add>, %4, %cst_3 [0] : vector<8x4xf32> to vector<4xf32>
    %6 = vector.shape_cast %5 : vector<4xf32> to vector<1x4xf32>
    %cst_4 = arith.constant 1.250000e-01 : f32
    %7 = vector.broadcast %cst_4 : f32 to vector<1x4xf32>
    %8 = arith.mulf %3, %7 : vector<1x4xf32>
    %cst_5 = arith.constant 1.250000e-01 : f32
    %9 = vector.broadcast %cst_5 : f32 to vector<1x4xf32>
    %10 = arith.mulf %6, %9 : vector<1x4xf32>
    %11 = arith.mulf %8, %8 : vector<1x4xf32>
    %12 = arith.subf %10, %11 : vector<1x4xf32>
    %cst_6 = arith.constant 0.000000e+00 : f32
    %13 = vector.broadcast %cst_6 : f32 to vector<1x4xf32>
    %14 = arith.maximumf %12, %13 : vector<1x4xf32>
    %15 = vector.extract_strided_slice %1 {offsets = [0, 0], sizes = [1, 4], strides = [1, 1]} : vector<8x128xf32> to vector<1x4xf32>
    %16 = vector.extract_strided_slice %1 {offsets = [1, 0], sizes = [1, 4], strides = [1, 1]} : vector<8x128xf32> to vector<1x4xf32>
    %17 = vector.broadcast %8 : vector<1x4xf32> to vector<8x4xf32>
    %18 = arith.subf %0, %17 : vector<8x4xf32>
    %cst_7 = arith.constant 9.99999974E-6 : f32
    %19 = vector.broadcast %cst_7 : f32 to vector<1x4xf32>
    %20 = arith.addf %14, %19 : vector<1x4xf32>
    %21 = math.rsqrt %20 : vector<1x4xf32>
    %22 = arith.mulf %21, %15 : vector<1x4xf32>
    %23 = vector.broadcast %22 : vector<1x4xf32> to vector<8x4xf32>
    %24 = arith.mulf %18, %23 : vector<8x4xf32>
    %25 = vector.broadcast %16 : vector<1x4xf32> to vector<8x4xf32>
    %26 = arith.addf %24, %25 : vector<8x4xf32>
    %27 = vector.extract_strided_slice %26 {offsets = [0, 0], sizes = [8, 1], strides = [1, 1]} : vector<8x4xf32> to vector<8x1xf32>
    %28 = vector.extract_strided_slice %1 {offsets = [2, 0], sizes = [1, 128], strides = [1, 1]} : vector<8x128xf32> to vector<1x128xf32>
    %29 = vector.broadcast %27 : vector<8x1xf32> to vector<8x128xf32>
    %30 = vector.broadcast %28 : vector<1x128xf32> to vector<8x128xf32>
    %31 = arith.mulf %29, %30 : vector<8x128xf32>
    %32 = vector.extract_strided_slice %1 {offsets = [6, 0], sizes = [1, 128], strides = [1, 1]} : vector<8x128xf32> to vector<1x128xf32>
    %33 = vector.broadcast %32 : vector<1x128xf32> to vector<8x128xf32>
    %34 = arith.addf %31, %33 : vector<8x128xf32>
    %35 = vector.extract_strided_slice %26 {offsets = [0, 1], sizes = [8, 1], strides = [1, 1]} : vector<8x4xf32> to vector<8x1xf32>
    %36 = vector.extract_strided_slice %1 {offsets = [3, 0], sizes = [1, 128], strides = [1, 1]} : vector<8x128xf32> to vector<1x128xf32>
    %37 = vector.broadcast %35 : vector<8x1xf32> to vector<8x128xf32>
    %38 = vector.broadcast %36 : vector<1x128xf32> to vector<8x128xf32>
    %39 = arith.mulf %37, %38 : vector<8x128xf32>
    %40 = arith.addf %34, %39 : vector<8x128xf32>
    %41 = vector.extract_strided_slice %26 {offsets = [0, 2], sizes = [8, 1], strides = [1, 1]} : vector<8x4xf32> to vector<8x1xf32>
    %42 = vector.extract_strided_slice %1 {offsets = [4, 0], sizes = [1, 128], strides = [1, 1]} : vector<8x128xf32> to vector<1x128xf32>
    %43 = vector.broadcast %41 : vector<8x1xf32> to vector<8x128xf32>
    %44 = vector.broadcast %42 : vector<1x128xf32> to vector<8x128xf32>
    %45 = arith.mulf %43, %44 : vector<8x128xf32>
    %46 = arith.addf %40, %45 : vector<8x128xf32>
    %47 = vector.extract_strided_slice %26 {offsets = [0, 3], sizes = [8, 1], strides = [1, 1]} : vector<8x4xf32> to vector<8x1xf32>
    %48 = vector.extract_strided_slice %1 {offsets = [5, 0], sizes = [1, 128], strides = [1, 1]} : vector<8x128xf32> to vector<1x128xf32>
    %49 = vector.broadcast %47 : vector<8x1xf32> to vector<8x128xf32>
    %50 = vector.broadcast %48 : vector<1x128xf32> to vector<8x128xf32>
    %51 = arith.mulf %49, %50 : vector<8x128xf32>
    %52 = arith.addf %46, %51 : vector<8x128xf32>
    %cst_8 = arith.constant 0.000000e+00 : f32
    %53 = vector.broadcast %cst_8 : f32 to vector<8x128xf32>
    %54 = arith.maximumf %52, %53 : vector<8x128xf32>
    %55 = vector.extract_strided_slice %1 {offsets = [7, 0], sizes = [1, 128], strides = [1, 1]} : vector<8x128xf32> to vector<1x128xf32>
    %56 = vector.extract_strided_slice %1 {offsets = [1, 64], sizes = [1, 1], strides = [1, 1]} : vector<8x128xf32> to vector<1x1xf32>
    %57 = vector.broadcast %55 : vector<1x128xf32> to vector<8x128xf32>
    %58 = arith.mulf %54, %57 : vector<8x128xf32>
    %cst_9 = arith.constant dense<0.000000e+00> : vector<8xf32>
    %59 = vector.multi_reduction <add>, %58, %cst_9 [1] : vector<8x128xf32> to vector<8xf32>
    %60 = vector.shape_cast %59 : vector<8xf32> to vector<8x1xf32>
    %61 = vector.broadcast %56 : vector<1x1xf32> to vector<8x1xf32>
    %62 = arith.addf %60, %61 : vector<8x1xf32>
    %c0_10 = arith.constant 0 : index
    %c0_11 = arith.constant 0 : index
    %63 = vector.load %arg2[%c0_10, %c0_11] : memref<8x1xf32, #tpu.memory_space<vmem>>, vector<8x1xf32>
    tpu.vector_store %arg2[%c0_10, %c0_11], %62 {strides = array<i32>} : memref<8x1xf32, #tpu.memory_space<vmem>>, vector<8x1xf32>,
    return
  }
}

</mosaic_0001>

<bundles_post_ra>
// kernel: relu_class1_norm1_forward.1
= control target key start
LH: loop header
LB: loop body
LE: loop exit
PB: predicated region body
PF: predicated region fallthrough
CT: control target
= control target key end

     0   :  { %vm13_vm0 = vcmask 31744   ;;  %v109_v0 = vmov 0   ;;  %v110_v21 = vmov 2   ;;  %v111_v38 = vmov 1   ;;  %s138_s0 = inlined_call_operand.vmem [shape: f32[8,4], index: 0, kind: input, shape index: {}]   ;;  %s139_s1 = inlined_call_operand.vmem [shape: f32[8,128], index: 1, kind: input, shape index: {}]   ;;  %s140_s2 = inlined_call_operand.vmem [shape: f32[8,1], index: 2, kind: output, shape index: {}]  }
   0x1   :  { %102 = vset.pattern.permute.xlu0 %v109_v0  ;;  %v11_v1 = vld [vmem:[%s138_s0] sm:$0xff]  ;;  %104 = vset.pattern.permute.xlu1 %v110_v21  ;;  %v112_v39 = vmov 3   ;;  %vm91_vm4 = vcmask 7168  }
   0x2   :  { %v14_v2 = vsel %vm13_vm0, %v11_v1, 0.0  ;;  %v21_v3 = vmul.f32 %v11_v1, %v11_v1  ;;  %v12_v29 = vld [vmem:[%s139_s1] sm:$0xff]  ;;  %s113_s1 = smov 64  }
   0x3   :  { %v15_v4 = vrot.slane %v14_v2, 4  ;;  %v49_v35 = vperm.slane %v12_v29, 1  ;;  %v56_v42 = vperm.slane %v12_v29, 2  ;;  %v58_v43 = vperm.slane %v12_v29, 6 }
   0x4   :  { %v22_v5 = vsel %vm13_vm0, %v21_v3, 0.0  ;;  %v64_v45 = vperm.slane %v12_v29, 3  ;;  %v71_v46 = vperm.slane %v12_v29, 4  ;;  %v78_v47 = vperm.slane %v12_v29, 5 }
   0x5   :  { %v16_v6 = vadd.f32 %v15_v4, %v14_v2  ;;  %v23_v7 = vrot.slane %v22_v5, 4  ;;  %v82_v57 = vperm.slane %v12_v29, 7 }
   0x7   :  { %v17_v8 = vrot.slane %v16_v6, 2  ;;  %v24_v9 = vadd.f32 %v23_v7, %v22_v5 }
   0x9   :  { %v18_v10 = vadd.f32 %v17_v8, %v16_v6  ;;  %v25_v11 = vrot.slane %v24_v9, 2 }
   0xb   :  { %v19_v12 = vrot.slane %v18_v10, 1  ;;  %v26_v13 = vadd.f32 %v25_v11, %v24_v9 }
   0xd   :  { %v20_v14 = vadd.f32 %v19_v12, %v18_v10  ;;  %v27_v15 = vrot.slane %v26_v13, 1 }
   0xf   :  { %v28_v16 = vadd.f32 %v27_v15, %v26_v13  ;;  %v29_v17 = vmul.f32 0.125, %v20_v14 }
  0x11   :  { %v30_v18 = vmul.f32 0.125, %v28_v16  ;;  %v31_v19 = vmul.f32 %v29_v17, %v29_v17  ;;  %v34_v32 = vsub.f32 %v11_v1, %v29_v17 }
  0x13   :  { %v32_v20 = vsub.f32 %v30_v18, %v31_v19 }
  0x15   :  { %v33_v22 = vmax.f32 %v32_v20, 0.0 }
  0x17   :  { %v35_v23 = vadd.f32 1e-05, %v33_v22 }
  0x19   :  { %107 = vrsqrt.f32 %v35_v23  ;;  %vm42_vm1 = vweird.f32 %v35_v23 }
  0x1f   :  { %v108_v24 = vpop.eup %107 }
  0x20   :  { %v37_v25 = vmul.f32 %v108_v24, %v35_v23  ;;  %vm43_vm2 = vweird.f32 %v108_v24 }
  0x21   :  { %vm44_vm3 = vmor %vm42_vm1, %vm43_vm2 }
  0x22   :  { %v38_v26 = vmul.f32 %v108_v24, %v37_v25 }
  0x24   :  { %v39_v27 = vmul.f32 0.5, %v38_v26 }
  0x26   :  { %v40_v28 = vsub.f32 1.5, %v39_v27 }
  0x28   :  { %v41_v30 = vmul.f32 %v108_v24, %v40_v28 }
  0x2a   :  { %v45_v31 = vsel %vm44_vm3, %v108_v24, %v41_v30 }
  0x2b   :  { %v46_v33 = vmul.f32 %v45_v31, %v12_v29 }
  0x2d   :  { %v47_v34 = vperm.slane %v46_v33, 0 }
  0x2f   :  { %v48_v36 = vmul.f32 %v47_v34, %v34_v32 }
  0x31   :  { %v50_v37 = vadd.f32 %v49_v35, %v48_v36 }
  0x33   :  { %53 = vperm.xlu0 %102, %v50_v37   ;;  %68 = vperm.xlu1 %104, %v50_v37  }
  0x3b   :  { %103 = vset.pattern.permute.xlu0 %v111_v38  ;;  %105 = vset.pattern.permute.xlu1 %v112_v39 }
  0x3c   :  { %61 = vperm.xlu0 %103, %v50_v37   ;;  %75 = vperm.xlu1 %105, %v50_v37  }
  0x44   :  { %106 = vset.pattern.permute.xlu0 %v112_v39 }
  0xa5   :  { %v54_v40 = vpop.permute.xlu0 %53  ;;  %v69_v41 = vpop.permute.xlu1 %68 }
  0xa6   :  { %v57_v44 = vmul.f32 %v56_v42, %v54_v40  ;;  %v72_v52 = vmul.f32 %v71_v46, %v69_v41 }
  0xa8   :  { %v59_v50 = vadd.f32 %v58_v43, %v57_v44 }
  0xae   :  { %v62_v48 = vpop.permute.xlu0 %61  ;;  %v76_v49 = vpop.permute.xlu1 %75 }
  0xaf   :  { %v65_v51 = vmul.f32 %v64_v45, %v62_v48  ;;  %v79_v54 = vmul.f32 %v78_v47, %v76_v49 }
  0xb1   :  { %v66_v53 = vadd.f32 %v65_v51, %v59_v50 }
  0xb3   :  { %v73_v55 = vadd.f32 %v72_v52, %v66_v53 }
  0xb5   :  { %v80_v56 = vadd.f32 %v79_v54, %v73_v55 }
  0xb7   :  { %v81_v58 = vmax.f32 %v80_v56, 0.0 }
  0xb9   :  { %v83_v59 = vmul.f32 %v82_v57, %v81_v58 }
  0xbb   :  { %84 = vadd.xlane.f32.xlu2 %v83_v59 }
 0x12e   :  { %v85_v60 = vpop.xlane.xlu2 %84 }
 0x12f   :  { %v86_v61 = vadd.f32 %v85_v60, %v49_v35 }
 0x131   :  { %88 = vrot.lane.b32.xlu2 %v86_v61, %s113_s1 }
 0x18b   :  { %v89_v62 = vpop.permute.xlu2 %88 }
 0x18c   :  { %92 = vst.msk [vmem:[%s140_s2] sm:$0xff] %vm91_vm4, %v89_v62 }

</bundles_post_ra>
